<compile_context>
chip_gen: v7x
topology: tpu7x:2x2x1
jax: 0.10.0
libtpu: 0.0.40
codegen_flags: <defaults>
</compile_context>

<pallas_src>
import jax
import jax.numpy as jnp
from jax.experimental import pallas as pl
from jax.experimental.pallas import tpu as pltpu


def _cdiv(a, b):
    return -(-a // b)


def _dice_partial_kernel(pred_ref, gt_ref, inter_ref, denom_ref):
    """One (N, TILE_R, 128) streaming step of the dice partial sums.

    pred_ref / gt_ref : (N, TILE_R, 128) VMEM input tiles (sublane/lane dense).
    inter_ref / denom_ref : (1, N, 128) f32 output blocks; their index_map is
    constant along the last grid axis, so they stay VMEM-resident and act as
    lane-dense accumulators across the reduction.
    """
    @pl.when(pl.program_id(1) == 0)
    def _():
        inter_ref[...] = jnp.zeros_like(inter_ref)
        denom_ref[...] = jnp.zeros_like(denom_ref)

    p = pred_ref[...].astype(jnp.float32)
    g = gt_ref[...].astype(jnp.float32)

    # Reduce only the sublane (TILE_R) axis per step; the 128-lane reduce and
    # the per-split combine happen once, in the JAX epilogue.
    inter_ref[...] += jnp.sum(p * g, axis=1)[None]
    denom_ref[...] += jnp.sum(p + g, axis=1)[None]


def dice_loss_fusion(pred, gt, eps=1e-12, *, target_step_bytes=4 << 20,
                     num_splits=None):
    """Pallas equivalent of the PyTorch dice_loss_fusion.forward (d=1 branch)."""
    assert pred.shape == gt.shape and pred.shape[1] == 1
    n = pred.shape[0]
    l = 1
    for d in pred.shape[1:]:
        l *= d

    pred_flat = pred.reshape(n, l)
    gt_flat = gt.reshape(n, l)
    itemsize = jnp.dtype(pred_flat.dtype).itemsize

    # ---- lane/sublane-dense tiling: (n, tile_r, 128) blocks -----------------
    r = _cdiv(l, 128)                       # rows of 128 lanes per sample
    # Size tile_r so one grid step moves ~target_step_bytes of input (both
    # inputs, single buffer); multiple of 8, never larger than the data.
    tile_r = target_step_bytes // (2 * n * 128 * itemsize)
    tile_r = max(8, (tile_r // 8) * 8)
    tile_r = min(tile_r, ((r + 7) // 8) * 8)

    num_tiles = _cdiv(r, tile_r)

    # ---- grid: (parallel L-split, streaming L reduction) --------------------
    if num_splits is None:
        kind = ""
        try:
            kind = jax.devices()[0].device_kind.lower()
        except Exception:
            pass
        multi_tc = any(t in kind for t in ("v7", "v4", "v5p"))
        ns = 2 if (multi_tc and num_tiles >= 2) else 1
    else:
        ns = int(num_splits) if num_tiles >= int(num_splits) >= 1 else 1

    kt = _cdiv(num_tiles, ns)
    r_pad = ns * kt * tile_r
    l_pad = r_pad * 128

    if l_pad != l:
        # Zero padding is neutral for all partial sums.
        pad = l_pad - l
        pred_flat = jnp.pad(pred_flat, ((0, 0), (0, pad)))
        gt_flat = jnp.pad(gt_flat, ((0, 0), (0, pad)))

    pred3 = pred_flat.reshape(n, r_pad, 128)
    gt3 = gt_flat.reshape(n, r_pad, 128)

    in_spec = pl.BlockSpec((n, tile_r, 128), lambda s, k: (0, s * kt + k, 0))
    out_spec = pl.BlockSpec((1, n, 128), lambda s, k: (s, 0, 0))
    part_shape = jax.ShapeDtypeStruct((ns, n, 128), jnp.float32)

    # VMEM accounting with the real (padded) footprint:
    #   2 inputs x 2 pipeline buffers x (n, tile_r, 128) tiles
    # + 2 outputs x 2 buffers x (ceil(n,8), 128) f32 accumulators, + headroom.
    n_pad8 = ((n + 7) // 8) * 8
    in_vmem = 2 * 2 * n * tile_r * 128 * itemsize
    out_vmem = 2 * 2 * n_pad8 * 128 * 4
    vmem_limit = int(min(32 << 20, max(in_vmem + out_vmem + (4 << 20), 8 << 20)))

    hbm_bytes = 2 * n * l_pad * itemsize + 2 * ns * n * 128 * 4

    inter_p, denom_p = pl.pallas_call(
        _dice_partial_kernel,
        out_shape=(part_shape, part_shape),
        grid_spec=pltpu.PrefetchScalarGridSpec(
            num_scalar_prefetch=0,
            grid=(ns, kt),
            in_specs=[in_spec, in_spec],
            out_specs=[out_spec, out_spec],
        ),
        compiler_params=pltpu.CompilerParams(
            dimension_semantics=("parallel", "arbitrary"),
            vmem_limit_bytes=vmem_limit,
        ),
        cost_estimate=pl.CostEstimate(
            flops=4 * n * l_pad,
            transcendentals=0,
            bytes_accessed=hbm_bytes,
        ),
    )(pred3, gt3)

    # Tiny epilogue in JAX: combine splits + 128 lanes, then dice -> loss.
    inter = jnp.sum(inter_p, axis=(0, 2))       # (N,)
    denom = jnp.sum(denom_p, axis=(0, 2))       # (N,)  == pred_sum + gt_sum
    dice = (2.0 * inter + eps) / (denom + eps)
    return 1.0 - jnp.mean(dice)


def _reference(pred, gt, eps=1e-12):
    n = pred.shape[0]
    pf = pred.reshape(n, -1).astype(jnp.float32)
    gf = gt.reshape(n, -1).astype(jnp.float32)
    dice = (2.0 * jnp.sum(pf * gf, axis=1) + eps) / (
        jnp.sum(pf, axis=1) + jnp.sum(gf, axis=1) + eps)
    return 1.0 - jnp.mean(dice)


if __name__ == "__main__":
    key = jax.random.PRNGKey(0)
    k1, k2, k3, k4 = jax.random.split(key, 4)

    # Case 1: single big block (L = 4096 -> one (2, 32, 128) tile).
    N, C, H, W = 2, 1, 64, 64
    pred = jax.nn.sigmoid(jax.random.normal(k1, (N, C, H, W), dtype=jnp.float32))
    gt = (jax.random.uniform(k2, (N, C, H, W)) > 0.5).astype(jnp.float32)
    loss = dice_loss_fusion(pred, gt)
    jax.block_until_ready(loss)
    loss_ref = _reference(pred, gt)
    assert jnp.allclose(loss, loss_ref, atol=1e-5, rtol=1e-5), (loss, loss_ref)

    # Case 2: ragged L (L = 2500, zero-padded to 3072 = 24 rows of 128).
    N2, C2, H2, W2 = 2, 1, 50, 50
    pred2 = jax.nn.sigmoid(jax.random.normal(k3, (N2, C2, H2, W2), dtype=jnp.float32))
    gt2 = (jax.random.uniform(k4, (N2, C2, H2, W2)) > 0.5).astype(jnp.float32)
    loss2 = dice_loss_fusion(pred2, gt2)
    jax.block_until_ready(loss2)
    loss2_ref = _reference(pred2, gt2)
    assert jnp.allclose(loss2, loss2_ref, atol=1e-5, rtol=1e-5), (loss2, loss2_ref)

    # Case 3: force the streaming + 2-way split path at small shapes
    # (tile_r = 8 -> 4 tiles -> grid (2, 2)) to exercise accumulation/combine.
    loss3 = dice_loss_fusion(pred, gt, target_step_bytes=16 * 1024, num_splits=2)
    jax.block_until_ready(loss3)
    assert jnp.allclose(loss3, loss_ref, atol=1e-5, rtol=1e-5), (loss3, loss_ref)

    print("KERNEL_OK")
</pallas_src>

<mosaic_0001>
module attributes {stable_mosaic.version = 11 : i64} {
  func.func @_dice_partial_kernel(%arg0: i32, %arg1: i32, %arg2: memref<2x32x128xf32, #tpu.memory_space<vmem>>, %arg3: memref<2x32x128xf32, #tpu.memory_space<vmem>>, %arg4: memref<1x2x128xf32, #tpu.memory_space<vmem>>, %arg5: memref<1x2x128xf32, #tpu.memory_space<vmem>>) attributes {dimension_semantics = [#tpu.dimension_semantics<parallel>, #tpu.dimension_semantics<arbitrary>], iteration_bounds = array<i64: 1, 1>, scalar_prefetch = 0 : i64, scratch_operands = 0 : i64, tpu.core_type = #tpu.core_type<tc>, window_params = [{transform_indices = @transform_0, window_bounds = array<i64: 2, 32, 128>}, {transform_indices = @transform_1, window_bounds = array<i64: 2, 32, 128>}, {transform_indices = @transform_2, window_bounds = array<i64: 1, 2, 128>}, {transform_indices = @transform_3, window_bounds = array<i64: 1, 2, 128>}]} {
    %c0_i32 = arith.constant 0 : i32
    %0 = arith.cmpi eq, %arg1, %c0_i32 : i32
    %1 = arith.extui %0 : i1 to i32
    %c0_i32_0 = arith.constant 0 : i32
    %2 = arith.cmpi ne, %1, %c0_i32_0 : i32
    scf.if %2 {
      %cst_19 = arith.constant 0.000000e+00 : f32
      %17 = vector.broadcast %cst_19 : f32 to vector<1x2x128xf32>
      %c0_20 = arith.constant 0 : index
      %c0_21 = arith.constant 0 : index
      %c0_22 = arith.constant 0 : index
      %18 = vector.load %arg4[%c0_20, %c0_21, %c0_22] : memref<1x2x128xf32, #tpu.memory_space<vmem>>, vector<1x2x128xf32>
      tpu.vector_store %arg4[%c0_20, %c0_21, %c0_22], %17 {strides = array<i32>} : memref<1x2x128xf32, #tpu.memory_space<vmem>>, vector<1x2x128xf32>,
      %cst_23 = arith.constant 0.000000e+00 : f32
      %19 = vector.broadcast %cst_23 : f32 to vector<1x2x128xf32>
      %c0_24 = arith.constant 0 : index
      %c0_25 = arith.constant 0 : index
      %c0_26 = arith.constant 0 : index
      %20 = vector.load %arg5[%c0_24, %c0_25, %c0_26] : memref<1x2x128xf32, #tpu.memory_space<vmem>>, vector<1x2x128xf32>
      tpu.vector_store %arg5[%c0_24, %c0_25, %c0_26], %19 {strides = array<i32>} : memref<1x2x128xf32, #tpu.memory_space<vmem>>, vector<1x2x128xf32>,
    } else {
    }
    %c0 = arith.constant 0 : index
    %c0_1 = arith.constant 0 : index
    %c0_2 = arith.constant 0 : index
    %3 = vector.load %arg2[%c0, %c0_1, %c0_2] : memref<2x32x128xf32, #tpu.memory_space<vmem>>, vector<2x32x128xf32>
    %c0_3 = arith.constant 0 : index
    %c0_4 = arith.constant 0 : index
    %c0_5 = arith.constant 0 : index
    %4 = vector.load %arg3[%c0_3, %c0_4, %c0_5] : memref<2x32x128xf32, #tpu.memory_space<vmem>>, vector<2x32x128xf32>
    %c0_6 = arith.constant 0 : index
    %c0_7 = arith.constant 0 : index
    %c0_8 = arith.constant 0 : index
    %5 = vector.load %arg4[%c0_6, %c0_7, %c0_8] : memref<1x2x128xf32, #tpu.memory_space<vmem>>, vector<1x2x128xf32>
    %6 = arith.mulf %3, %4 : vector<2x32x128xf32>
    %cst = arith.constant dense<0.000000e+00> : vector<2x128xf32>
    %7 = vector.multi_reduction <add>, %6, %cst [1] : vector<2x32x128xf32> to vector<2x128xf32>
    %8 = vector.shape_cast %7 : vector<2x128xf32> to vector<1x2x128xf32>
    %9 = arith.addf %5, %8 : vector<1x2x128xf32>
    %c0_9 = arith.constant 0 : index
    %c0_10 = arith.constant 0 : index
    %c0_11 = arith.constant 0 : index
    %10 = vector.load %arg4[%c0_9, %c0_10, %c0_11] : memref<1x2x128xf32, #tpu.memory_space<vmem>>, vector<1x2x128xf32>
    tpu.vector_store %arg4[%c0_9, %c0_10, %c0_11], %9 {strides = array<i32>} : memref<1x2x128xf32, #tpu.memory_space<vmem>>, vector<1x2x128xf32>,
    %c0_12 = arith.constant 0 : index
    %c0_13 = arith.constant 0 : index
    %c0_14 = arith.constant 0 : index
    %11 = vector.load %arg5[%c0_12, %c0_13, %c0_14] : memref<1x2x128xf32, #tpu.memory_space<vmem>>, vector<1x2x128xf32>
    %12 = arith.addf %3, %4 : vector<2x32x128xf32>
    %cst_15 = arith.constant dense<0.000000e+00> : vector<2x128xf32>
    %13 = vector.multi_reduction <add>, %12, %cst_15 [1] : vector<2x32x128xf32> to vector<2x128xf32>
    %14 = vector.shape_cast %13 : vector<2x128xf32> to vector<1x2x128xf32>
    %15 = arith.addf %11, %14 : vector<1x2x128xf32>
    %c0_16 = arith.constant 0 : index
    %c0_17 = arith.constant 0 : index
    %c0_18 = arith.constant 0 : index
    %16 = vector.load %arg5[%c0_16, %c0_17, %c0_18] : memref<1x2x128xf32, #tpu.memory_space<vmem>>, vector<1x2x128xf32>
    tpu.vector_store %arg5[%c0_16, %c0_17, %c0_18], %15 {strides = array<i32>} : memref<1x2x128xf32, #tpu.memory_space<vmem>>, vector<1x2x128xf32>,
    return
  }
  func.func @transform_0(%arg0: i32, %arg1: i32) -> (i32, i32, i32) {
    %c1_i32 = arith.constant 1 : i32
    %0 = arith.muli %arg0, %c1_i32 : i32
    %1 = arith.addi %0, %arg1 : i32
    %c0_i32 = arith.constant 0 : i32
    %c0_i32_0 = arith.constant 0 : i32
    %c0_i32_1 = arith.constant 0 : i32
    return %c0_i32, %1, %c0_i32_0 : i32, i32, i32
  }
  func.func @transform_1(%arg0: i32, %arg1: i32) -> (i32, i32, i32) {
    %c1_i32 = arith.constant 1 : i32
    %0 = arith.muli %arg0, %c1_i32 : i32
    %1 = arith.addi %0, %arg1 : i32
    %c0_i32 = arith.constant 0 : i32
    %c0_i32_0 = arith.constant 0 : i32
    %c0_i32_1 = arith.constant 0 : i32
    return %c0_i32, %1, %c0_i32_0 : i32, i32, i32
  }
  func.func @transform_2(%arg0: i32, %arg1: i32) -> (i32, i32, i32) {
    %c0_i32 = arith.constant 0 : i32
    %c0_i32_0 = arith.constant 0 : i32
    %c0_i32_1 = arith.constant 0 : i32
    return %arg0, %c0_i32, %c0_i32_0 : i32, i32, i32
  }
  func.func @transform_3(%arg0: i32, %arg1: i32) -> (i32, i32, i32) {
    %c0_i32 = arith.constant 0 : i32
    %c0_i32_0 = arith.constant 0 : i32
    %c0_i32_1 = arith.constant 0 : i32
    return %arg0, %c0_i32, %c0_i32_0 : i32, i32, i32
  }
}

</mosaic_0001>

<bundles_post_ra>
// kernel: tpu_custom_call.1
= control target key start
LH: loop header
LB: loop body
LE: loop exit
PB: predicated region body
PF: predicated region fallthrough
CT: control target
= control target key end

     0   :  { %9 = vsyncpa [#allocation3], 0  ;;  %s352_s0 = inlined_call_operand.hbm [shape: f32[2,32,128], index: 0, kind: input, shape index: {}]   ;;  %s353_s1 = inlined_call_operand.hbm [shape: f32[2,32,128], index: 1, kind: input, shape index: {}]   ;;  %s354_s2 = inlined_call_operand.hbm [shape: f32[1,2,128], index: 2, kind: output, shape index: {0}]   ;;  %s355_s3 = inlined_call_operand.hbm [shape: f32[1,2,128], index: 3, kind: output, shape index: {1}]  }
   0x1   :  { %10 = vsyncpa [#allocation6], 0 }
   0x2   :  { %11 = vsyncpa [#allocation4], 0 }
   0x3   :  { %12 = vsyncpa [#allocation9], 0  ;;  %s277_s12 = smov [#allocation2]   ;;  %s181_s16 = scalar_lea.hbm %s352_s0, 1024 }
   0x4   :  { %s22_s13 = sshll.u32 %s277_s12, 4  ;;  %p182_p0 = scmp.ne.s32.totalorder %s352_s0, %s181_s16  ;;  %s23_s13 = int_to_ptr.vmem [resolvable:$true] %s22_s13 }
   0x5   :  { %p185_p1 = scmp.lt.u32.totalorder %s181_s16, %s352_s0 }
   0x7   :  { %p187_p2 = pnand %p185_p1, %p182_p0 }
   0x9   :  { %190 = shalt.err (!%p187_p2)
}
   0xa   :  { %s191_s21 = scalar_lea.vmem %s23_s13, 1024  ;;  %p196_p4 = scmp.lt.s32.totalorder %s23_s13, %s23_s13 }
   0xb   :  { %p192_p3 = scmp.ne.s32.totalorder %s23_s13, %s191_s21  ;;  %p197_p5 = scmp.lt.s32.totalorder %s191_s21, %s191_s21 }
   0xd   :  { %p198_p6 = por %p197_p5, %p196_p4 }
   0xf   :  { %p199_p7 = pnand %p198_p6, %p192_p3 }
  0x11   :  { %202 = shalt.err (!%p199_p7)
}
  0x12   :  { %s278_s22 = smov 128   ;;  %s279_s23 = smov 8  }
  0x13   :  { %28 = dma.hbm_to_vmem [thread:$0]  %s352_s0, 1024, %s23_s13, [#allocation3], %s278_s22, %s278_s22, %s279_s23  }
  0x14   :  { %s280_s26 = smov [#allocation5]   ;;  %s203_s30 = scalar_lea.hbm %s353_s1, 1024 }
  0x15   :  { %s38_s27 = sshll.u32 %s280_s26, 4  ;;  %p204_p8 = scmp.ne.s32.totalorder %s353_s1, %s203_s30  ;;  %s39_s27 = int_to_ptr.vmem [resolvable:$true] %s38_s27 }
  0x16   :  { %p207_p9 = scmp.lt.u32.totalorder %s203_s30, %s353_s1 }
  0x18   :  { %p209_p10 = pnand %p207_p9, %p204_p8 }
  0x1a   :  { %212 = shalt.err (!%p209_p10)
}
  0x1b   :  { %s213_s8 = scalar_lea.vmem %s39_s27, 1024  ;;  %p218_p12 = scmp.lt.s32.totalorder %s39_s27, %s39_s27 }
  0x1c   :  { %p214_p11 = scmp.ne.s32.totalorder %s39_s27, %s213_s8  ;;  %p219_p13 = scmp.lt.s32.totalorder %s213_s8, %s213_s8 }
  0x1e   :  { %p220_p0 = por %p219_p13, %p218_p12 }
  0x20   :  { %p221_p1 = pnand %p220_p0, %p214_p11 }
  0x22   :  { %224 = shalt.err (!%p221_p1)
}
  0x23   :  { %44 = dma.hbm_to_vmem [thread:$0]  %s353_s1, 1024, %s39_s27, [#allocation6], %s278_s22, %s278_s22, %s279_s23  }
  0x24   :  { %269 = dma.done.wait [#allocation3], 1024  }
  0x25   :  { %270 = vsyncadd [#allocation3], 4294966272 }
  0x26   :  { %271 = dma.done.wait [#allocation6], 1024  }
  0x27   :  { %272 = vsyncadd [#allocation6], 4294966272  ;;  %v281_v0 = vmov 0.0   ;;  %v61_v1 = vld [vmem:[#allocation2] sm:$0xff]  ;;  %v62_v2 = vld [vmem:[#allocation2 + $0x8] sm:$0xff]  ;;  %vm106_vm0 = vcmask 1041409  }
  0x28   :  { %59 = vst [vmem:[#allocation7] sm:$0x3] %v281_v0  ;;  %60 = vst [vmem:[#allocation8] sm:$0x3] %v281_v0  ;;  %v63_v3 = vld [vmem:[#allocation2 + $0x10] sm:$0xff]  ;;  %v64_v4 = vld [vmem:[#allocation2 + $0x18] sm:$0xff] }
  0x29   :  { %v65_v5 = vld [vmem:[#allocation2 + $0x20] sm:$0xff]  ;;  %v66_v6 = vld [vmem:[#allocation2 + $0x28] sm:$0xff]  ;;  %v67_v7 = vld [vmem:[#allocation2 + $0x30] sm:$0xff]  ;;  %s282_s1 = smov [#allocation7]   ;;  %s283_s11 = smov [#allocation8]  }
  0x2a   :  { %v68_v8 = vld [vmem:[#allocation2 + $0x38] sm:$0xff]  ;;  %v69_v9 = vld [vmem:[#allocation5] sm:$0xff]  ;;  %v70_v10 = vld [vmem:[#allocation5 + $0x8] sm:$0xff]  ;;  %s150_s10 = sshll.u32 %s282_s1, 4  ;;  %s160_s12 = sshll.u32 %s283_s11, 4  ;;  %s151_s10 = int_to_ptr.vmem [resolvable:$true] %s150_s10  ;;  %s161_s12 = int_to_ptr.vmem [resolvable:$true] %s160_s12 }
  0x2b   :  { %v71_v11 = vld [vmem:[#allocation5 + $0x10] sm:$0xff]  ;;  %v72_v12 = vld [vmem:[#allocation5 + $0x18] sm:$0xff]  ;;  %v78_v13 = vmul.f32 %v69_v9, %v61_v1  ;;  %v73_v14 = vld [vmem:[#allocation5 + $0x20] sm:$0xff]  ;;  %v79_v17 = vmul.f32 %v70_v10, %v62_v2  ;;  %v112_v19 = vadd.f32 %v69_v9, %v61_v1  ;;  %v113_v20 = vadd.f32 %v70_v10, %v62_v2  ;;  %s225_s13 = scalar_lea.vmem %s151_s10, 32  ;;  %p230_p3 = scmp.lt.s32.totalorder %s151_s10, %s151_s10 }
  0x2c   :  { %v74_v15 = vld [vmem:[#allocation5 + $0x28] sm:$0xff]  ;;  %v75_v16 = vld [vmem:[#allocation5 + $0x30] sm:$0xff]  ;;  %v80_v18 = vmul.f32 %v71_v11, %v63_v3  ;;  %v76_v21 = vld [vmem:[#allocation5 + $0x38] sm:$0xff]  ;;  %v82_v22 = vmul.f32 %v73_v14, %v65_v5  ;;  %v81_v25 = vmul.f32 %v72_v12, %v64_v4  ;;  %v114_v27 = vadd.f32 %v71_v11, %v63_v3  ;;  %p226_p2 = scmp.ne.s32.totalorder %s151_s10, %s225_s13  ;;  %p231_p4 = scmp.lt.s32.totalorder %s225_s13, %s225_s13 }
  0x2d   :  { %v83_v23 = vmul.f32 %v74_v15, %v66_v6  ;;  %v84_v24 = vmul.f32 %v75_v16, %v67_v7  ;;  %v86_v26 = vadd.f32 %v79_v17, %v78_v13  ;;  %v116_v28 = vadd.f32 %v73_v14, %v65_v5 }
  0x2e   :  { %v85_v29 = vmul.f32 %v76_v21, %v68_v8  ;;  %v117_v31 = vadd.f32 %v74_v15, %v66_v6  ;;  %v118_v32 = vadd.f32 %v75_v16, %v67_v7  ;;  %v115_v34 = vadd.f32 %v72_v12, %v64_v4  ;;  %p232_p5 = por %p231_p4, %p230_p3 }
  0x2f   :  { %v95_v30 = vadd.f32 %v83_v23, %v82_v22  ;;  %v87_v33 = vadd.f32 %v86_v26, %v80_v18  ;;  %v120_v35 = vadd.f32 %v113_v20, %v112_v19  ;;  %v119_v37 = vadd.f32 %v76_v21, %v68_v8  ;;  %v77_v1 = vld [vmem:[#allocation7] sm:$0x3]  ;;  %v111_v6 = vld [vmem:[#allocation8] sm:$0x3] }
  0x30   :  { %v129_v38 = vadd.f32 %v117_v31, %v116_v28  ;;  %p233_p6 = pnand %p232_p5, %p226_p2 }
  0x31   :  { %v96_v36 = vadd.f32 %v95_v30, %v84_v24  ;;  %v88_v39 = vadd.f32 %v87_v33, %v81_v25  ;;  %v121_v40 = vadd.f32 %v120_v35, %v114_v27 }
  0x32   :  { %v130_v42 = vadd.f32 %v129_v38, %v118_v32 }
  0x33   :  { %v97_v41 = vadd.f32 %v96_v36, %v85_v29  ;;  %v89_v43 = vrot.slane %v88_v39, 4  ;;  %v122_v44 = vadd.f32 %v121_v40, %v115_v34 }
  0x34   :  { %v131_v46 = vadd.f32 %v130_v42, %v119_v37 }
  0x35   :  { %v98_v45 = vrot.slane %v97_v41, 4  ;;  %v90_v47 = vadd.f32 %v89_v43, %v88_v39  ;;  %v123_v48 = vrot.slane %v122_v44, 4 }
  0x36   :  { %v132_v50 = vrot.slane %v131_v46, 4 }
  0x37   :  { %v99_v49 = vadd.f32 %v98_v45, %v97_v41  ;;  %v91_v51 = vrot.slane %v90_v47, 2  ;;  %v124_v52 = vadd.f32 %v123_v48, %v122_v44 }
  0x38   :  { %v133_v54 = vadd.f32 %v132_v50, %v131_v46 }
  0x39   :  { %v100_v53 = vrot.slane %v99_v49, 2  ;;  %v92_v55 = vadd.f32 %v91_v51, %v90_v47  ;;  %v125_v56 = vrot.slane %v124_v52, 2 }
  0x3a   :  { %v134_v58 = vrot.slane %v133_v54, 2 }
  0x3b   :  { %v101_v57 = vadd.f32 %v100_v53, %v99_v49  ;;  %v93_v59 = vrot.slane %v92_v55, 1  ;;  %v126_v60 = vadd.f32 %v125_v56, %v124_v52 }
  0x3c   :  { %v135_v62 = vadd.f32 %v134_v58, %v133_v54 }
  0x3d   :  { %v102_v61 = vrot.slane %v101_v57, 1  ;;  %v94_v63 = vadd.f32 %v93_v59, %v92_v55  ;;  %v127_v0 = vrot.slane %v126_v60, 1 }
  0x3e   :  { %v136_v3 = vrot.slane %v135_v62, 1 }
  0x3f   :  { %v103_v2 = vadd.f32 %v102_v61, %v101_v57  ;;  %v128_v4 = vadd.f32 %v127_v0, %v126_v60 }
  0x40   :  { %v137_v7 = vadd.f32 %v136_v3, %v135_v62 }
  0x41   :  { %v107_v5 = vsel %vm106_vm0, %v103_v2, %v94_v63 }
  0x42   :  { %v109_v8 = vadd.f32 %v107_v5, %v77_v1  ;;  %v140_v9 = vsel %vm106_vm0, %v137_v7, %v128_v4 }
  0x43   :  { %v142_v10 = vadd.f32 %v140_v9, %v111_v6 }
  0x44   :  { %110 = vst [vmem:[#allocation7] sm:$0x3] %v109_v8 }
  0x45   :  { %236 = shalt.err (!%p233_p6)
}
  0x46   :  { %s237_s16 = scalar_lea.hbm %s354_s2, 32 }
  0x47   :  { %p238_p7 = scmp.ne.s32.totalorder %s354_s2, %s237_s16  ;;  %p241_p8 = scmp.lt.u32.totalorder %s237_s16, %s354_s2 }
  0x49   :  { %p243_p9 = pnand %p241_p8, %p238_p7 }
  0x4b   :  { %246 = shalt.err (!%p243_p9)
}
  0x4c   :  { %153 = dma.vmem_to_hbm [thread:$0]  %s151_s10, 32, %s354_s2, [#allocation4]   ;;  %143 = vst [vmem:[#allocation8] sm:$0x3] %v142_v10 }
  0x4d   :  { %s247_s23 = scalar_lea.vmem %s161_s12, 32  ;;  %p252_p11 = scmp.lt.s32.totalorder %s161_s12, %s161_s12 }
  0x4e   :  { %p248_p10 = scmp.ne.s32.totalorder %s161_s12, %s247_s23  ;;  %p253_p12 = scmp.lt.s32.totalorder %s247_s23, %s247_s23 }
  0x50   :  { %p254_p13 = por %p253_p12, %p252_p11 }
  0x52   :  { %p255_p0 = pnand %p254_p13, %p248_p10 }
  0x54   :  { %258 = shalt.err (!%p255_p0)
}
  0x55   :  { %s259_s26 = scalar_lea.hbm %s355_s3, 32 }
  0x56   :  { %p260_p1 = scmp.ne.s32.totalorder %s355_s3, %s259_s26  ;;  %p263_p2 = scmp.lt.u32.totalorder %s259_s26, %s355_s3 }
  0x58   :  { %p265_p3 = pnand %p263_p2, %p260_p1 }
  0x5a   :  { %268 = shalt.err (!%p265_p3)
}
  0x5b   :  { %163 = dma.vmem_to_hbm [thread:$0]  %s161_s12, 32, %s355_s3, [#allocation9]  }
  0x5c   :  { %273 = dma.done.wait [#allocation4], 32  }
  0x5d   :  { %274 = vsyncadd [#allocation4], 4294967264 }
  0x5e   :  { %275 = dma.done.wait [#allocation9], 32  }
  0x5f   :  { %276 = vsyncadd [#allocation9], 4294967264 }
  0x60   :  { %170 = vsyncpa [#allocation3], 1 }
  0x61   :  { %171 = vsyncpa [#allocation6], 1 }
  0x62   :  { %172 = vsyncpa [#allocation4], 1 }
  0x63   :  { %173 = vsyncpa [#allocation9], 1 }

</bundles_post_ra>
